<compile_context>
chip_gen: v7x
topology: tpu7x:2x2x1
jax: 0.10.0
libtpu: 0.0.40
codegen_flags: <defaults>
</compile_context>

<pallas_src>
import functools
import math

import jax
import jax.numpy as jnp
from jax.experimental import pallas as pl
from jax.experimental.pallas import tpu as pltpu


def _round_up(x, m):
    return ((x + m - 1) // m) * m


def _sublane_multiple(itemsize):
    # f32 -> 8 sublanes / vreg, bf16/f16 -> 16, int8/fp8 -> 32.
    return max(8, 32 // max(int(itemsize), 1))


def _vmem_budget_and_limit():
    """Derive (tile budget, vmem_limit_bytes) from the actual chip."""
    try:
        cap = int(pltpu.get_tpu_info().vmem_capacity_bytes)
    except Exception:
        cap = 64 * 1024 * 1024                      # conservative (v7x per-TC VMEM)
    limit = min((cap * 3) // 4, 96 * 1024 * 1024)   # ~48 MiB on v7x, 96 MiB on v5e/v6e
    budget = limit // 2                             # headroom for compiler scratch
    return budget, limit


def _pick_row_tile(rows, n_cls, in_dim, x_bytes, out_bytes, p_bytes, *, norm, budget):
    """Largest row tile (multiple of lcm(n_cls, sublane)) fitting the VMEM budget,
    capped so the row grid keeps >= ~8 steps (pipeline overlap + v7x megacore)."""
    unit = math.lcm(n_cls, _sublane_multiple(x_bytes))
    if rows <= unit:
        return int(rows)                 # single full-extent block on the row axis
    # Per row of tile: double-buffered x/out tiles, resident (worst-case
    # double-buffered) pre-tiled scale+shift, and (norm path) f32 temporaries
    # for the sum-of-squares statistics.
    per_row = 2 * in_dim * (x_bytes + out_bytes) + 4 * in_dim * p_bytes
    if norm:
        per_row += 2 * in_dim * 4
    budget_rows = max(unit, (budget // per_row) // unit * unit)
    steps_rows = max(unit, _round_up(-(-rows // 8), unit))     # keep >= ~8 grid steps
    tr = min(budget_rows, steps_rows, _round_up(rows, unit))
    return int(tr)


def _multi_ssf_kernel(x_ref, scale_ref, shift_ref, out_ref, *, norm):
    # x_ref / out_ref: (tr, d) streaming tiles.
    # scale_ref / shift_ref: (tr, d) grid-invariant, resident, pre-tiled per class.
    x = x_ref[...]
    scale = scale_ref[...]
    shift = shift_ref[...]
    if norm:
        # Only the statistics go through f32 (VPU square, XLU lane-reduce, EUP
        # rsqrt); the 1/||x|| factor is folded into the scale so the normalized
        # x is never materialized / rounded as a separate tensor.
        xf = x.astype(jnp.float32)
        inv = jax.lax.rsqrt(jnp.sum(xf * xf, axis=-1, keepdims=True))   # (tr, 1)
        scale = inv * scale.astype(jnp.float32)
    out_ref[...] = (x * scale + shift).astype(out_ref.dtype)


def multi_ssf(x, scale, shift, *, norm=False, row_tile=None):
    """x: [..., n_cls, in_dim]; scale/shift: [n_cls, in_dim]."""
    n_cls, in_dim = scale.shape
    assert shift.shape == (n_cls, in_dim)
    assert x.shape[-2:] == (n_cls, in_dim), (x.shape, scale.shape)

    lead = x.shape[:-2]
    rows = (math.prod(lead) if lead else 1) * n_cls
    x2 = x.reshape(rows, in_dim)

    out_dtype = jnp.result_type(x.dtype, scale.dtype, shift.dtype)

    # Lane-dense feature axis: pad to a multiple of 128 only when needed
    # (zero columns do not perturb the L2 norm).
    d = _round_up(in_dim, 128)
    if d != in_dim:
        x2 = jnp.pad(x2, ((0, 0), (0, d - in_dim)))
        scale_p = jnp.pad(scale, ((0, 0), (0, d - in_dim)))
        shift_p = jnp.pad(shift, ((0, 0), (0, d - in_dim)))
    else:
        scale_p, shift_p = scale, shift

    x_bytes = jnp.dtype(x.dtype).itemsize
    out_bytes = jnp.dtype(out_dtype).itemsize
    p_bytes = max(jnp.dtype(scale.dtype).itemsize, jnp.dtype(shift.dtype).itemsize)

    budget, vmem_limit = _vmem_budget_and_limit()
    tr = row_tile if row_tile is not None else _pick_row_tile(
        rows, n_cls, d, x_bytes, out_bytes, p_bytes, norm=norm, budget=budget)
    assert tr % n_cls == 0, (tr, n_cls)

    # Pre-tile scale/shift to the row-tile height: tr is a multiple of n_cls, so
    # every grid step starts at class 0 and one resident (tr, d) block serves
    # all row tiles.
    reps = tr // n_cls
    scale_t = jnp.tile(scale_p, (reps, 1)) if reps > 1 else scale_p
    shift_t = jnp.tile(shift_p, (reps, 1)) if reps > 1 else shift_p

    grid = (pl.cdiv(rows, tr),)
    kernel = functools.partial(_multi_ssf_kernel, norm=norm)

    grid_spec = pltpu.PrefetchScalarGridSpec(
        num_scalar_prefetch=0,
        grid=grid,
        in_specs=[
            pl.BlockSpec((tr, d), lambda i: (i, 0)),   # streaming x tile
            pl.BlockSpec((tr, d), lambda i: (0, 0)),   # resident scale (pre-tiled)
            pl.BlockSpec((tr, d), lambda i: (0, 0)),   # resident shift (pre-tiled)
        ],
        out_specs=pl.BlockSpec((tr, d), lambda i: (i, 0)),
    )

    flops = 2 * rows * d + (3 * rows * d if norm else 0)
    cost = pl.CostEstimate(
        flops=flops,
        transcendentals=rows if norm else 0,
        bytes_accessed=rows * d * (x_bytes + out_bytes) + 2 * tr * d * p_bytes,
    )

    out = pl.pallas_call(
        kernel,
        out_shape=jax.ShapeDtypeStruct((rows, d), out_dtype),
        grid_spec=grid_spec,
        compiler_params=pltpu.CompilerParams(
            dimension_semantics=("parallel",),   # row tiles are independent
            vmem_limit_bytes=vmem_limit,
        ),
        cost_estimate=cost,
    )(x2, scale_t, shift_t)

    if d != in_dim:
        out = out[:, :in_dim]
    return out.reshape(x.shape)


def multi_ssf_reference(x, scale, shift, *, norm=False):
    if norm:
        x = x / jnp.linalg.norm(x, axis=-1, keepdims=True)
    return x * scale + shift


if __name__ == "__main__":
    # Small deterministic shapes consistent with the module:
    #   x: [batch, n_cls, in_dim], scale/shift: [n_cls, in_dim].
    B, n_cls, in_dim = 2, 4, 128

    key = jax.random.PRNGKey(0)
    kx, ks, kh = jax.random.split(key, 3)
    x = jax.random.normal(kx, (B, n_cls, in_dim), dtype=jnp.float32)
    # nn.init.normal_(scale, mean=1.0, std=0.02); nn.init.normal_(shift, std=0.02)
    scale = 1.0 + 0.02 * jax.random.normal(ks, (n_cls, in_dim), dtype=jnp.float32)
    shift = 0.02 * jax.random.normal(kh, (n_cls, in_dim), dtype=jnp.float32)

    out_plain = jax.block_until_ready(multi_ssf(x, scale, shift, norm=False))
    out_norm = jax.block_until_ready(multi_ssf(x, scale, shift, norm=True))

    ref_plain = multi_ssf_reference(x, scale, shift, norm=False)
    ref_norm = multi_ssf_reference(x, scale, shift, norm=True)

    assert out_plain.shape == (B, n_cls, in_dim)
    assert out_norm.shape == (B, n_cls, in_dim)
    assert jnp.allclose(out_plain, ref_plain, atol=1e-5, rtol=1e-5)
    assert jnp.allclose(out_norm, ref_norm, atol=1e-5, rtol=1e-5)

    print("KERNEL_OK")
</pallas_src>

<mosaic_0001>
module attributes {stable_mosaic.version = 11 : i64} {
  func.func @_multi_ssf_kernel(%arg0: i32, %arg1: memref<8x128xf32, #tpu.memory_space<vmem>>, %arg2: memref<8x128xf32, #tpu.memory_space<vmem>>, %arg3: memref<8x128xf32, #tpu.memory_space<vmem>>, %arg4: memref<8x128xf32, #tpu.memory_space<vmem>>) attributes {dimension_semantics = [#tpu.dimension_semantics<parallel>], iteration_bounds = array<i64: 1>, scalar_prefetch = 0 : i64, scratch_operands = 0 : i64, tpu.core_type = #tpu.core_type<tc>, window_params = [{transform_indices = @transform_0, window_bounds = array<i64: 8, 128>}, {pipeline_mode = #tpu.pipeline_mode<synchronous>, transform_indices = @transform_1, window_bounds = array<i64: 8, 128>}, {pipeline_mode = #tpu.pipeline_mode<synchronous>, transform_indices = @transform_2, window_bounds = array<i64: 8, 128>}, {transform_indices = @transform_3, window_bounds = array<i64: 8, 128>}]} {
    %c0 = arith.constant 0 : index
    %c0_0 = arith.constant 0 : index
    %0 = vector.load %arg1[%c0, %c0_0] : memref<8x128xf32, #tpu.memory_space<vmem>>, vector<8x128xf32>
    %c0_1 = arith.constant 0 : index
    %c0_2 = arith.constant 0 : index
    %1 = vector.load %arg2[%c0_1, %c0_2] : memref<8x128xf32, #tpu.memory_space<vmem>>, vector<8x128xf32>
    %c0_3 = arith.constant 0 : index
    %c0_4 = arith.constant 0 : index
    %2 = vector.load %arg3[%c0_3, %c0_4] : memref<8x128xf32, #tpu.memory_space<vmem>>, vector<8x128xf32>
    %3 = arith.mulf %0, %1 : vector<8x128xf32>
    %4 = arith.addf %3, %2 : vector<8x128xf32>
    %c0_5 = arith.constant 0 : index
    %c0_6 = arith.constant 0 : index
    %5 = vector.load %arg4[%c0_5, %c0_6] : memref<8x128xf32, #tpu.memory_space<vmem>>, vector<8x128xf32>
    tpu.vector_store %arg4[%c0_5, %c0_6], %4 {strides = array<i32>} : memref<8x128xf32, #tpu.memory_space<vmem>>, vector<8x128xf32>,
    return
  }
  func.func @transform_0(%arg0: i32) -> (i32, i32) {
    %c0_i32 = arith.constant 0 : i32
    %c0_i32_0 = arith.constant 0 : i32
    return %arg0, %c0_i32 : i32, i32
  }
  func.func @transform_1(%arg0: i32) -> (i32, i32) {
    %c0_i32 = arith.constant 0 : i32
    %c0_i32_0 = arith.constant 0 : i32
    %c0_i32_1 = arith.constant 0 : i32
    return %c0_i32, %c0_i32_0 : i32, i32
  }
  func.func @transform_2(%arg0: i32) -> (i32, i32) {
    %c0_i32 = arith.constant 0 : i32
    %c0_i32_0 = arith.constant 0 : i32
    %c0_i32_1 = arith.constant 0 : i32
    return %c0_i32, %c0_i32_0 : i32, i32
  }
  func.func @transform_3(%arg0: i32) -> (i32, i32) {
    %c0_i32 = arith.constant 0 : i32
    %c0_i32_0 = arith.constant 0 : i32
    return %arg0, %c0_i32 : i32, i32
  }
}

</mosaic_0001>

<bundles_post_ra>
// kernel: tpu_custom_call.1
= control target key start
LH: loop header
LB: loop body
LE: loop exit
PB: predicated region body
PF: predicated region fallthrough
CT: control target
= control target key end

     0   :  { %8 = vsyncpa [#allocation3], 0  ;;  %s242_s0 = inlined_call_operand.hbm [shape: f32[8,128], index: 0, kind: input, shape index: {}]   ;;  %s243_s1 = inlined_call_operand.hbm [shape: f32[8,128], index: 1, kind: input, shape index: {}]   ;;  %s244_s2 = inlined_call_operand.hbm [shape: f32[8,128], index: 2, kind: input, shape index: {}]   ;;  %s245_s3 = inlined_call_operand.hbm [shape: f32[8,128], index: 3, kind: output, shape index: {}]  }
   0x1   :  { %9 = vsyncpa [#allocation6], 0 }
   0x2   :  { %10 = vsyncpa [#allocation4], 0  ;;  %s170_s12 = smov [#allocation5]   ;;  %s171_s14 = smov [#allocation2]  }
   0x3   :  { %s27_s13 = sshll.u32 %s170_s12, 4  ;;  %s17_s15 = sshll.u32 %s171_s14, 4  ;;  %s28_s13 = int_to_ptr.vmem [resolvable:$true] %s27_s13  ;;  %s18_s15 = int_to_ptr.vmem [resolvable:$true] %s17_s15 }
   0x4   :  { %s76_s18 = scalar_lea.hbm %s243_s1, 128 }
   0x5   :  { %p77_p0 = scmp.ne.s32.totalorder %s243_s1, %s76_s18  ;;  %p80_p1 = scmp.lt.u32.totalorder %s76_s18, %s243_s1 }
   0x7   :  { %p82_p2 = pnand %p80_p1, %p77_p0 }
   0x9   :  { %85 = shalt.err (!%p82_p2)
}
   0xa   :  { %s86_s23 = scalar_lea.vmem %s28_s13, 128  ;;  %p91_p4 = scmp.lt.s32.totalorder %s28_s13, %s28_s13 }
   0xb   :  { %p87_p3 = scmp.ne.s32.totalorder %s28_s13, %s86_s23  ;;  %p92_p5 = scmp.lt.s32.totalorder %s86_s23, %s86_s23 }
   0xd   :  { %p93_p6 = por %p92_p5, %p91_p4 }
   0xf   :  { %p94_p7 = pnand %p93_p6, %p87_p3 }
  0x11   :  { %97 = shalt.err (!%p94_p7)
}
  0x12   :  { %30 = dma.hbm_to_vmem [thread:$0]  %s243_s1, 128, %s28_s13, [#allocation6]  }
  0x13   :  { %s98_s28 = scalar_lea.hbm %s242_s0, 128 }
  0x14   :  { %p99_p8 = scmp.ne.s32.totalorder %s242_s0, %s98_s28  ;;  %p102_p9 = scmp.lt.u32.totalorder %s98_s28, %s242_s0 }
  0x16   :  { %p104_p10 = pnand %p102_p9, %p99_p8 }
  0x18   :  { %107 = shalt.err (!%p104_p10)
}
  0x19   :  { %s108_s6 = scalar_lea.vmem %s18_s15, 128  ;;  %p113_p12 = scmp.lt.s32.totalorder %s18_s15, %s18_s15 }
  0x1a   :  { %p109_p11 = scmp.ne.s32.totalorder %s18_s15, %s108_s6  ;;  %p114_p13 = scmp.lt.s32.totalorder %s108_s6, %s108_s6 }
  0x1c   :  { %p115_p0 = por %p114_p13, %p113_p12 }
  0x1e   :  { %p116_p1 = pnand %p115_p0, %p109_p11 }
  0x20   :  { %119 = shalt.err (!%p116_p1)
}
  0x21   :  { %20 = dma.hbm_to_vmem [thread:$0]  %s242_s0, 128, %s18_s15, [#allocation3]  }
  0x22   :  { %s172_s8 = smov [#allocation7]   ;;  %s120_s12 = scalar_lea.hbm %s244_s2, 128 }
  0x23   :  { %s37_s9 = sshll.u32 %s172_s8, 4  ;;  %p121_p2 = scmp.ne.s32.totalorder %s244_s2, %s120_s12  ;;  %s38_s9 = int_to_ptr.vmem [resolvable:$true] %s37_s9 }
  0x24   :  { %p124_p3 = scmp.lt.u32.totalorder %s120_s12, %s244_s2 }
  0x26   :  { %p126_p4 = pnand %p124_p3, %p121_p2 }
  0x28   :  { %129 = shalt.err (!%p126_p4)
}
  0x29   :  { %s130_s18 = scalar_lea.vmem %s38_s9, 128  ;;  %p135_p6 = scmp.lt.s32.totalorder %s38_s9, %s38_s9 }
  0x2a   :  { %p131_p5 = scmp.ne.s32.totalorder %s38_s9, %s130_s18  ;;  %p136_p7 = scmp.lt.s32.totalorder %s130_s18, %s130_s18 }
  0x2c   :  { %p137_p8 = por %p136_p7, %p135_p6 }
  0x2e   :  { %p138_p9 = pnand %p137_p8, %p131_p5 }
  0x30   :  { %141 = shalt.err (!%p138_p9)
}
  0x31   :  { %40 = dma.hbm_to_vmem [thread:$0]  %s244_s2, 128, %s38_s9, [#allocation6]  }
  0x32   :  { %164 = dma.done.wait [#allocation3], 128  }
  0x33   :  { %165 = vsyncadd [#allocation3], 4294967168 }
  0x34   :  { %166 = dma.done.wait [#allocation6], 256  }
  0x35   :  { %167 = vsyncadd [#allocation6], 4294967040  ;;  %v50_v0 = vld [vmem:[#allocation2] sm:$0xff]  ;;  %v51_v1 = vld [vmem:[#allocation5] sm:$0xff]  ;;  %s173_s19 = smov [#allocation8]  }
  0x36   :  { %v52_v2 = vld [vmem:[#allocation7] sm:$0xff]  ;;  %s62_s20 = sshll.u32 %s173_s19, 4  ;;  %v53_v3 = vmul.f32 %v51_v1, %v50_v0  ;;  %s63_s20 = int_to_ptr.vmem [resolvable:$true] %s62_s20 }
  0x37   :  { %s142_s21 = scalar_lea.vmem %s63_s20, 128  ;;  %p147_p11 = scmp.lt.s32.totalorder %s63_s20, %s63_s20 }
  0x38   :  { %v54_v4 = vadd.f32 %v53_v3, %v52_v2  ;;  %p143_p10 = scmp.ne.s32.totalorder %s63_s20, %s142_s21  ;;  %p148_p12 = scmp.lt.s32.totalorder %s142_s21, %s142_s21 }
  0x3a   :  { %55 = vst [vmem:[#allocation8] sm:$0xff] %v54_v4  ;;  %p149_p13 = por %p148_p12, %p147_p11 }
  0x3c   :  { %p150_p0 = pnand %p149_p13, %p143_p10 }
  0x3e   :  { %153 = shalt.err (!%p150_p0)
}
  0x3f   :  { %s154_s23 = scalar_lea.hbm %s245_s3, 128 }
  0x40   :  { %p155_p1 = scmp.ne.s32.totalorder %s245_s3, %s154_s23  ;;  %p158_p2 = scmp.lt.u32.totalorder %s154_s23, %s245_s3 }
  0x42   :  { %p160_p3 = pnand %p158_p2, %p155_p1 }
  0x44   :  { %163 = shalt.err (!%p160_p3)
}
  0x45   :  { %65 = dma.vmem_to_hbm [thread:$0]  %s63_s20, 128, %s245_s3, [#allocation4]  }
  0x46   :  { %168 = dma.done.wait [#allocation4], 128  }
  0x47   :  { %169 = vsyncadd [#allocation4], 4294967168 }
  0x48   :  { %69 = vsyncpa [#allocation3], 1 }
  0x49   :  { %70 = vsyncpa [#allocation6], 1 }
  0x4a   :  { %71 = vsyncpa [#allocation4], 1 }

</bundles_post_ra>
